<compile_context>
chip_gen: v5e
topology: v5e:2x2
jax: 0.10.0
libtpu: 0.0.40
codegen_flags: <defaults>
</compile_context>

<pallas_src>
import functools

import numpy as np
import jax
import jax.numpy as jnp
from jax.experimental import pallas as pl
from jax.experimental.pallas import tpu as pltpu


# ----------------------------- host-side glue -------------------------------
def compute_partition(clust_assigns):
    """Same semantics as the PyTorch helper (numpy, static)."""
    where_change = np.nonzero(np.diff(clust_assigns))[0]
    where_change = np.append(where_change, len(clust_assigns) - 1)
    unique_clusts = clust_assigns[where_change]
    where_change = np.append(-1, where_change)
    lengths = np.diff(where_change)
    return lengths.tolist(), unique_clusts


def _pick_tile(n, d):
    """Largest multiple-of-128 tile over N that divides N and keeps the per-tile
    r block <= ~2 MiB, so double-buffered inputs stay far below the scoped-VMEM
    budget on every chip (incl. v7x's 64 MiB physical / 32 MiB scoped)."""
    cap = (2 * 1024 * 1024) // (4 * max(d, 1))
    cap = max(128, (cap // 128) * 128)
    t = min(cap, 512)
    while t >= 128:
        if n % t == 0:
            return t
        t -= 128
    return n  # small / odd N: single whole-array tile (block == full dims -> legal)


# ------------------------------ phase 1 kernel -------------------------------
def _phase1_kernel(r_ref, w_ref, means_ref, ssq_ref):
    """Accumulate cluster means and sum of squared feature norms over N-tiles."""
    @pl.when(pl.program_id(0) == 0)
    def _init():
        means_ref[...] = jnp.zeros_like(means_ref)
        ssq_ref[...] = jnp.zeros_like(ssq_ref)

    r = r_ref[...]                                           # (tn, D) f32
    # (M, tn) @ (tn, D) on the MXU.  inv_len is already folded into w, so the
    # accumulated result is directly the cluster means (no extra scaling pass).
    means_ref[...] += jnp.dot(w_ref[...], r, preferred_element_type=jnp.float32)
    ssq_ref[...] += jnp.sum(r * r).reshape(1, 1)


# ------------------------------ phase 2 kernel -------------------------------
def _phase2_kernel(vn_ref, means_ref, r_ref, w_ref, diff_ref, loss_ref, *,
                   exp_neg_alpha, epsilon, mxu_dtype):
    """Per-tile magnet losses, lane-dense (clusters on sublanes, samples on lanes)."""
    vn = vn_ref[0, 0]                                        # scalar from SMEM
    r = r_ref[...]                                           # (tn, D)
    means = means_ref[...]                                   # (M, D)

    # ||r_n - mu_m||^2 laid out as (M, tn): samples sit on the 128-lane axis.
    m_sq = jnp.sum(means * means, axis=1, keepdims=True)     # (M, 1)
    ones_row = jnp.ones((1, r.shape[1]), jnp.float32)
    r_sq = jnp.einsum("kd,nd->kn", ones_row, r * r,
                      preferred_element_type=jnp.float32)    # (1, tn) via MXU
    cross = jnp.einsum("md,nd->mn",
                       means.astype(mxu_dtype), r.astype(mxu_dtype),
                       preferred_element_type=jnp.float32)   # (M, tn), no transpose
    costs = jnp.maximum(m_sq + r_sq - 2.0 * cross, 0.0)      # (M, tn)

    e = jnp.exp(vn * costs)                                  # (M, tn) EUP, lane dense
    intra = (w_ref[...] > 0.0).astype(jnp.float32)           # one-hot membership mask
    # numerator reuses e: exp(vn*own_cost - alpha) == exp(-alpha) * selected exp
    numer = exp_neg_alpha * jnp.sum(intra * e, axis=0, keepdims=True)      # (1, tn)
    denom = jnp.sum(diff_ref[...] * e, axis=0, keepdims=True)              # (1, tn)

    loss_ref[...] = jnp.maximum(
        -jnp.log(numer / (denom + epsilon) + epsilon), 0.0)                # (1, tn)


# --------------------------------- wrapper -----------------------------------
def magnet_loss(r, classes_np, assigned_clusters_np, alpha=1.0, epsilon=1e-8,
                mxu_dtype=jnp.float32):
    """r: (N, D) float features; classes_np / assigned_clusters_np: numpy int (N,).
    Set mxu_dtype=jnp.bfloat16 for the bandwidth/MXU-rate win on v5e/v6e (trades
    some accuracy in the distance matmul); default keeps full f32 accuracy."""
    lengths, unique_clusts = compute_partition(np.asarray(assigned_clusters_np))
    lengths_np = np.asarray(lengths)
    N, D = r.shape
    M = len(lengths)

    clusters_np = np.asarray(assigned_clusters_np)
    cls_np = np.asarray(classes_np)
    uniq_np = np.asarray(unique_clusts)
    cluster_cls_np = cls_np[np.cumsum(lengths_np) - 1]

    # Static host-side mask prep (lane-dense (M, N) layout, inv_len folded in).
    intra_w_np = (uniq_np[:, None] == clusters_np[None, :]).astype(np.float32)
    intra_w_np = intra_w_np / lengths_np[:, None].astype(np.float32)
    diff_np = (cluster_cls_np[:, None] != cls_np[None, :]).astype(np.float32)

    r32 = jnp.asarray(r, jnp.float32)
    intra_w = jnp.asarray(intra_w_np)          # (M, N) f32, one-hot * inv_len
    diff = jnp.asarray(diff_np)                # (M, N) f32, different-class mask
    lens = jnp.asarray(lengths_np, jnp.float32)

    tn = _pick_tile(N, D)
    n_tiles = N // tn
    vmem_limit = 32 * 1024 * 1024              # explicit, v7x-safe

    # ---- phase 1: cluster means + sum ||r||^2 (pipelined reduction over N) ----
    means, ssq = pl.pallas_call(
        _phase1_kernel,
        out_shape=(jax.ShapeDtypeStruct((M, D), jnp.float32),
                   jax.ShapeDtypeStruct((1, 1), jnp.float32)),
        grid_spec=pltpu.PrefetchScalarGridSpec(
            num_scalar_prefetch=0,
            grid=(n_tiles,),
            in_specs=[pl.BlockSpec((tn, D), lambda i: (i, 0)),
                      pl.BlockSpec((M, tn), lambda i: (0, i))],
            out_specs=[pl.BlockSpec((M, D), lambda i: (0, 0)),
                       pl.BlockSpec((1, 1), lambda i: (0, 0))]),
        compiler_params=pltpu.CompilerParams(
            dimension_semantics=("arbitrary",),
            vmem_limit_bytes=vmem_limit),
    )(r32, intra_w)

    # sum_i ||r_i - mu_{c(i)}||^2 == sum_i ||r_i||^2 - sum_c len_c ||mu_c||^2
    intra_total = ssq[0, 0] - jnp.sum(lens * jnp.sum(means * means, axis=1))
    variance = intra_total / float(N - 1)
    var_norm = -1.0 / (2.0 * jnp.maximum(variance, 1e-30))   # guard against var==0
    vn_arr = jnp.reshape(var_norm, (1, 1)).astype(jnp.float32)

    # ---- phase 2: per-sample losses (independent N-tiles, megacore parallel) ----
    kernel2 = functools.partial(_phase2_kernel,
                                exp_neg_alpha=float(np.exp(-float(alpha))),
                                epsilon=float(epsilon),
                                mxu_dtype=mxu_dtype)
    losses2d = pl.pallas_call(
        kernel2,
        out_shape=jax.ShapeDtypeStruct((1, N), jnp.float32),
        grid_spec=pltpu.PrefetchScalarGridSpec(
            num_scalar_prefetch=0,
            grid=(n_tiles,),
            in_specs=[pl.BlockSpec(memory_space=pltpu.MemorySpace.SMEM),  # var_norm
                      pl.BlockSpec((M, D), lambda i: (0, 0)),             # means (resident)
                      pl.BlockSpec((tn, D), lambda i: (i, 0)),            # r tile
                      pl.BlockSpec((M, tn), lambda i: (0, i)),            # intra weights
                      pl.BlockSpec((M, tn), lambda i: (0, i))],           # diff-class mask
            out_specs=pl.BlockSpec((1, tn), lambda i: (0, i))),           # lane-dense losses
        compiler_params=pltpu.CompilerParams(
            dimension_semantics=("parallel",),
            vmem_limit_bytes=vmem_limit),
    )(vn_arr, means, r32, intra_w, diff)

    losses = losses2d.reshape(N)
    total = jnp.mean(losses)
    return total, losses, variance


# ------------------------------ pure reference ------------------------------
def magnet_loss_ref(r, classes_np, assigned_clusters_np, alpha=1.0, epsilon=1e-8):
    lengths, unique_clusts = compute_partition(np.asarray(assigned_clusters_np))
    r = np.asarray(r, np.float64)
    splits = np.split(r, np.cumsum(lengths)[:-1], axis=0)
    means = np.stack([x.mean(0) for x in splits])
    sample_costs = ((r[:, None, :] - means[None, :, :]) ** 2).sum(-1)
    intra_mask = (np.asarray(assigned_clusters_np)[:, None]
                  == np.asarray(unique_clusts)[None, :])
    intra_costs = (intra_mask * sample_costs).sum(1)
    N = r.shape[0]
    variance = intra_costs.sum() / float(N - 1)
    vn = -1.0 / (2.0 * variance)
    numerator = np.exp(vn * intra_costs - alpha)
    cluster_classes = np.asarray(classes_np)[np.cumsum(lengths) - 1]
    diff_mask = np.asarray(classes_np)[:, None] != cluster_classes[None, :]
    denominator = (diff_mask * np.exp(vn * sample_costs)).sum(1)
    losses = np.maximum(-np.log(numerator / (denominator + epsilon) + epsilon), 0.0)
    return losses.mean(), losses, variance


# ----------------------------------- main ------------------------------------
if __name__ == "__main__":
    key = jax.random.PRNGKey(0)
    N, D = 1024, 64                      # 4 clusters x 256 samples, 64-d features
    r = jax.random.normal(key, (N, D), dtype=jnp.float32)

    # sorted / contiguous cluster assignments (as MagnetLoss expects)
    assigned_clusters = np.repeat(np.arange(4), N // 4).astype(np.int64)
    classes = np.repeat(np.array([0, 0, 1, 1]), N // 4).astype(np.int64)

    total, losses, variance = magnet_loss(r, classes, assigned_clusters)
    (total, losses, variance) = jax.block_until_ready((total, losses, variance))

    total_ref, losses_ref, var_ref = magnet_loss_ref(
        np.asarray(r), classes, assigned_clusters)

    assert np.allclose(np.asarray(total), total_ref, rtol=1e-4, atol=1e-4), \
        (float(total), float(total_ref))
    assert np.allclose(np.asarray(losses), losses_ref, rtol=1e-4, atol=1e-4)
    assert np.allclose(np.asarray(variance), var_ref, rtol=1e-4, atol=1e-4), \
        (float(variance), float(var_ref))

    print("KERNEL_OK")
</pallas_src>

<mosaic_0001>
module attributes {stable_mosaic.version = 11 : i64} {
  func.func @_phase1_kernel(%arg0: i32, %arg1: memref<512x64xf32, #tpu.memory_space<vmem>>, %arg2: memref<4x512xf32, #tpu.memory_space<vmem>>, %arg3: memref<4x64xf32, #tpu.memory_space<vmem>>, %arg4: memref<1x1xf32, #tpu.memory_space<vmem>>) attributes {dimension_semantics = [#tpu.dimension_semantics<arbitrary>], iteration_bounds = array<i64: 2>, scalar_prefetch = 0 : i64, scratch_operands = 0 : i64, tpu.core_type = #tpu.core_type<tc>, window_params = [{transform_indices = @transform_0, window_bounds = array<i64: 512, 64>}, {transform_indices = @transform_1, window_bounds = array<i64: 4, 512>}, {pipeline_mode = #tpu.pipeline_mode<synchronous>, transform_indices = @transform_2, window_bounds = array<i64: 4, 64>}, {pipeline_mode = #tpu.pipeline_mode<synchronous>, transform_indices = @transform_3, window_bounds = array<i64: 1, 1>}]} {
    %c0_i32 = arith.constant 0 : i32
    %0 = arith.cmpi eq, %arg0, %c0_i32 : i32
    %1 = arith.extui %0 : i1 to i32
    %c0_i32_0 = arith.constant 0 : i32
    %2 = arith.cmpi ne, %1, %c0_i32_0 : i32
    scf.if %2 {
      %cst_13 = arith.constant 0.000000e+00 : f32
      %18 = vector.broadcast %cst_13 : f32 to vector<4x64xf32>
      %c0_14 = arith.constant 0 : index
      %c0_15 = arith.constant 0 : index
      %19 = vector.load %arg3[%c0_14, %c0_15] : memref<4x64xf32, #tpu.memory_space<vmem>>, vector<4x64xf32>
      tpu.vector_store %arg3[%c0_14, %c0_15], %18 {strides = array<i32>} : memref<4x64xf32, #tpu.memory_space<vmem>>, vector<4x64xf32>,
      %cst_16 = arith.constant 0.000000e+00 : f32
      %20 = vector.broadcast %cst_16 : f32 to vector<1x1xf32>
      %c0_17 = arith.constant 0 : index
      %c0_18 = arith.constant 0 : index
      %21 = vector.load %arg4[%c0_17, %c0_18] : memref<1x1xf32, #tpu.memory_space<vmem>>, vector<1x1xf32>
      tpu.vector_store %arg4[%c0_17, %c0_18], %20 {strides = array<i32>} : memref<1x1xf32, #tpu.memory_space<vmem>>, vector<1x1xf32>,
    } else {
    }
    %c0 = arith.constant 0 : index
    %c0_1 = arith.constant 0 : index
    %3 = vector.load %arg1[%c0, %c0_1] : memref<512x64xf32, #tpu.memory_space<vmem>>, vector<512x64xf32>
    %c0_2 = arith.constant 0 : index
    %c0_3 = arith.constant 0 : index
    %4 = vector.load %arg3[%c0_2, %c0_3] : memref<4x64xf32, #tpu.memory_space<vmem>>, vector<4x64xf32>
    %c0_4 = arith.constant 0 : index
    %c0_5 = arith.constant 0 : index
    %5 = vector.load %arg2[%c0_4, %c0_5] : memref<4x512xf32, #tpu.memory_space<vmem>>, vector<4x512xf32>
    %cst = arith.constant dense<0.000000e+00> : vector<4x64xf32>
    %6 = tpu.matmul %5, %3, %cst {dimension_numbers = #tpu.dot_dimension_numbers<[1], [0], [0], [1], [0, 0, 1, 1], [], []>} : vector<4x512xf32>, vector<512x64xf32>, vector<4x64xf32> -> vector<4x64xf32>
    %7 = arith.addf %4, %6 : vector<4x64xf32>
    %c0_6 = arith.constant 0 : index
    %c0_7 = arith.constant 0 : index
    %8 = vector.load %arg3[%c0_6, %c0_7] : memref<4x64xf32, #tpu.memory_space<vmem>>, vector<4x64xf32>
    tpu.vector_store %arg3[%c0_6, %c0_7], %7 {strides = array<i32>} : memref<4x64xf32, #tpu.memory_space<vmem>>, vector<4x64xf32>,
    %c0_8 = arith.constant 0 : index
    %c0_9 = arith.constant 0 : index
    %9 = vector.load %arg4[%c0_8, %c0_9] : memref<1x1xf32, #tpu.memory_space<vmem>>, vector<1x1xf32>
    %10 = arith.mulf %3, %3 : vector<512x64xf32>
    %11 = vector.shape_cast %10 : vector<512x64xf32> to vector<1x512x64xf32>
    %cst_10 = arith.constant dense<0.000000e+00> : vector<1xf32>
    %12 = vector.multi_reduction <add>, %11, %cst_10 [1, 2] : vector<1x512x64xf32> to vector<1xf32>
    %13 = vector.shape_cast %12 : vector<1xf32> to vector<1x1x1xf32>
    %14 = vector.extract %13[0, 0, 0] : f32 from vector<1x1x1xf32>
    %15 = vector.broadcast %14 : f32 to vector<1x1xf32>
    %16 = arith.addf %9, %15 : vector<1x1xf32>
    %c0_11 = arith.constant 0 : index
    %c0_12 = arith.constant 0 : index
    %17 = vector.load %arg4[%c0_11, %c0_12] : memref<1x1xf32, #tpu.memory_space<vmem>>, vector<1x1xf32>
    tpu.vector_store %arg4[%c0_11, %c0_12], %16 {strides = array<i32>} : memref<1x1xf32, #tpu.memory_space<vmem>>, vector<1x1xf32>,
    return
  }
  func.func @transform_0(%arg0: i32) -> (i32, i32) {
    %c0_i32 = arith.constant 0 : i32
    %c0_i32_0 = arith.constant 0 : i32
    return %arg0, %c0_i32 : i32, i32
  }
  func.func @transform_1(%arg0: i32) -> (i32, i32) {
    %c0_i32 = arith.constant 0 : i32
    %c0_i32_0 = arith.constant 0 : i32
    return %c0_i32, %arg0 : i32, i32
  }
  func.func @transform_2(%arg0: i32) -> (i32, i32) {
    %c0_i32 = arith.constant 0 : i32
    %c0_i32_0 = arith.constant 0 : i32
    %c0_i32_1 = arith.constant 0 : i32
    return %c0_i32, %c0_i32_0 : i32, i32
  }
  func.func @transform_3(%arg0: i32) -> (i32, i32) {
    %c0_i32 = arith.constant 0 : i32
    %c0_i32_0 = arith.constant 0 : i32
    %c0_i32_1 = arith.constant 0 : i32
    return %c0_i32, %c0_i32_0 : i32, i32
  }
}

</mosaic_0001>

<bundles_post_ra>
// kernel: tpu_custom_call.1
= control target key start
LH: loop header
LB: loop body
LE: loop exit
PB: predicated region body
PF: predicated region fallthrough
CT: control target
= control target key end

     0   :  { %9 = vsyncpa [#allocation3], 0  ;;  %s1196_s0 = inlined_call_operand.vmem [shape: f32[1024,64], index: 0, kind: input, shape index: {}]   ;;  %s1197_s1 = inlined_call_operand.vmem [shape: f32[4,1024], index: 1, kind: input, shape index: {}]   ;;  %s1198_s2 = inlined_call_operand.hbm [shape: f32[4,64], index: 2, kind: output, shape index: {0}]   ;;  %s1199_s3 = inlined_call_operand.hbm [shape: f32[1,1], index: 3, kind: output, shape index: {1}]  }
   0x1   :  { %10 = vsyncpa [#allocation5], 0  ;;  %s776_s12 = smov 0  }
   0x2 LB: > { %s782_s13 = sadd.s32 4294967295, %s751_s12   ;;  %p644_p0 = scmp.ge.s32.totalorder %s751_s12, 1  ;;  %s751_s12 = sphi %s776_s12, %s16_s12  }
   0x3   : > { %p144_p1 = scmp.lt.s32.totalorder %s751_s12, 3 }
   0x5   : > { %p145_p2 = pnand %p644_p0, %p144_p1 }
   0x6   : > { %s645_s14 = sshll.u32 (!%p145_p2), %s782_s13, 6  ;;  %s647_s15 = sshll.u32 (!%p145_p2), %s782_s13, 2 }
   0x7   : > { %148 = sbr.rel (%p145_p2) target bundleno = 340 (0x154), region = 28  ;;  %p169_p3 = scmp.lt.s32.totalorder (!%p145_p2), %s645_s14, 127 }
   0x8   : > { %p175_p4 = scmp.lt.s32.totalorder (!%p145_p2), %s647_s15, 7  ;;  %p649_p5 = scmp.ne.s32.totalorder (!%p145_p2), %s782_s13, 0 }
   0xc   : > { %s1201_s14 = smov (!%p169_p3, %s645_s14), 127  ;;  %s1203_s15 = smov (!%p175_p4, %s647_s15), 7 }
   0xd   : > { %s646_s16 = sshll.u32 %s1201_s14, 3  ;;  %s648_s20 = sshll.u32 %s1203_s15, 2 }
   0xe   : > { %s791_s19 = scalar_lea.vmem %s1196_s0, %s646_s16  ;;  %s796_s23 = scalar_lea.vmem %s1197_s1, %s648_s20 }
   0xf   : > { %183 = sbr.rel (%p649_p5) target bundleno = 23 (0x17), region = 32 }
  0x14   : > { %vm184_vm0 = vcmask 519168   ;;  %vm186_vm1 = vcmask 0   ;;  %v753_v0 = vmov 0.0  }
  0x15   : > { %185 = vst.msk [vmem:[#allocation2] sm:$0xf] %vm184_vm0, %v753_v0 }
  0x16   : > { %187 = vst.msk [vmem:[#allocation4] sm:$0x1] %vm186_vm1, %v753_v0 }
  0x17 PF: > { %v800_v1 = vld [vmem:[%s791_s19] sm:$0xff]  ;;  %v803_v2 = vld [vmem:[%s791_s19 + $0x8] sm:$0xff]  ;;  %v806_v3 = vld [vmem:[%s791_s19 + $0x10] sm:$0xff]  ;;  %vm416_vm2 = vcmask 523264   ;;  %s754_s24 = smov [#allocation2]   ;;  %s565_s28 = sshll.u32 %s1198_s2, 4  ;;  %s566_s28 = int_to_ptr.hbm [resolvable:$true] %s565_s28 }
  0x18   : > { %v809_v4 = vld [vmem:[%s791_s19 + $0x18] sm:$0xff]  ;;  %v352_v5 = vmul.f32 %v800_v1, %v800_v1  ;;  %v353_v6 = vmul.f32 %v803_v2, %v803_v2  ;;  %v354_v7 = vmul.f32 %v806_v3, %v806_v3  ;;  %v818_v8 = vld [vmem:[%s791_s19 + $0x20] sm:$0xff]  ;;  %v825_v12 = vld [vmem:[%s791_s19 + $0x28] sm:$0xff]  ;;  %s563_s25 = sshll.u32 %s754_s24, 4  ;;  %p666_p6 = scmp.eq.s32.totalorder %s782_s13, 1  ;;  %vm349_vm3 = vcmask 519168   ;;  %s564_s25 = int_to_ptr.vmem [resolvable:$true] %s563_s25 }
  0x19   : > { %v355_v10 = vmul.f32 %v809_v4, %v809_v4  ;;  %v828_v13 = vld [vmem:[%s791_s19 + $0x78] sm:$0xff]  ;;  %v356_v15 = vmul.f32 %v818_v8, %v818_v8  ;;  %v835_v17 = vld [vmem:[%s791_s19 + $0x30] sm:$0xff]  ;;  %v357_v20 = vmul.f32 %v825_v12, %v825_v12  ;;  %v201_v23 = vld [vmem:[%s791_s19 + $0x68] sm:$0xff]  ;;  %s755_s29 = smov [#allocation4]   ;;  %s577_s6 = sshll.u32 %s1199_s3, 4  ;;  %vm555_vm4 = vcmask 0   ;;  %s578_s6 = int_to_ptr.hbm [resolvable:$true] %s577_s6 }
  0x1a   : > { %v417_v9 = vsel %vm416_vm2, %v352_v5, 0.0  ;;  %v418_v11 = vsel %vm416_vm2, %v353_v6, 0.0  ;;  %v420_v16 = vsel %vm416_vm2, %v354_v7, 0.0  ;;  %268 = vmatpush.msra.mxu0 %v828_v13  ;;  %v838_v18 = vld [vmem:[%s791_s19 + $0x70] sm:$0xff]  ;;  %v195_v22 = vld [vmem:[%s791_s19 + $0x38] sm:$0xff]  ;;  %v358_v26 = vmul.f32 %v835_v17, %v835_v17  ;;  %v196_v28 = vld [vmem:[%s791_s19 + $0x40] sm:$0xff] }
  0x1b   : > { %v419_v14 = vadd.f32 %v418_v11, %v417_v9  ;;  %v422_v21 = vsel %vm416_vm2, %v355_v10, 0.0  ;;  %v847_v25 = vld [vmem:[%s791_s19 + $0xf8] sm:$0xff]  ;;  %v424_v27 = vsel %vm416_vm2, %v356_v15, 0.0  ;;  %v200_v29 = vld [vmem:[%s791_s19 + $0x60] sm:$0xff]  ;;  %v856_v31 = vld [vmem:[%s791_s19 + $0xf0] sm:$0xff]  ;;  %v359_v32 = vmul.f32 %v195_v22, %v195_v22  ;;  %s575_s30 = sshll.u32 %s755_s29, 4  ;;  %s576_s30 = int_to_ptr.vmem [resolvable:$true] %s575_s30 }
  0x1c   : > { %269 = vmatpush.msra.mxu0 %v838_v18  ;;  %288 = vmatpush.msra.mxu1 %v847_v25  ;;  %v426_v33 = vsel %vm416_vm2, %v357_v20, 0.0  ;;  %v197_v34 = vld [vmem:[%s791_s19 + $0x48] sm:$0xff]  ;;  %v199_v35 = vld [vmem:[%s791_s19 + $0x58] sm:$0xff]  ;;  %v360_v38 = vmul.f32 %v196_v28, %v196_v28  ;;  %v428_v39 = vsel %vm416_vm2, %v358_v26, 0.0  ;;  %v198_v40 = vld [vmem:[%s791_s19 + $0x50] sm:$0xff]  ;;  %v364_v55 = vmul.f32 %v200_v29, %v200_v29 }
  0x1d   : > { %v421_v19 = vadd.f32 %v420_v16, %v419_v14  ;;  %v863_v37 = vld [vmem:[%s791_s19 + $0xe8] sm:$0xff]  ;;  %v868_v41 = vld [vmem:[%s791_s19 + $0x178] sm:$0xff]  ;;  %v872_v43 = vld [vmem:[%s791_s19 + $0xe0] sm:$0xff]  ;;  %v361_v44 = vmul.f32 %v197_v34, %v197_v34  ;;  %v430_v45 = vsel %vm416_vm2, %v359_v32, 0.0  ;;  %v362_v49 = vmul.f32 %v198_v40, %v198_v40 }
  0x1e   : > { %270 = vmatpush.msra.mxu0 %v201_v23  ;;  %289 = vmatpush.msra.mxu1 %v856_v31  ;;  %v877_v46 = vld [vmem:[%s791_s19 + $0x170] sm:$0xff]  ;;  %v881_v48 = vld [vmem:[%s791_s19 + $0xd8] sm:$0xff]  ;;  %v363_v50 = vmul.f32 %v199_v35, %v199_v35  ;;  %v432_v51 = vsel %vm416_vm2, %v360_v38, 0.0  ;;  %v886_v52 = vld [vmem:[%s791_s19 + $0x168] sm:$0xff]  ;;  %v365_v61 = vmul.f32 %v201_v23, %v201_v23  ;;  %v366_v9 = vmul.f32 %v838_v18, %v838_v18 }
  0x1f   : > { %v423_v24 = vadd.f32 %v422_v21, %v421_v19  ;;  %308 = vmatpush.msra.mxu2 %v868_v41  ;;  %v890_v54 = vld [vmem:[%s791_s19 + $0xd0] sm:$0xff]  ;;  %v434_v56 = vsel %vm416_vm2, %v361_v44, 0.0  ;;  %v895_v57 = vld [vmem:[%s791_s19 + $0x160] sm:$0xff]  ;;  %v898_v58 = vld [vmem:[%s791_s19 + $0x1f8] sm:$0xff]  ;;  %v436_v62 = vsel %vm416_vm2, %v362_v49, 0.0  ;;  %v440_v10 = vsel %vm416_vm2, %v364_v55, 0.0 }
  0x20   : > { %271 = vmatpush.msra.mxu0 %v200_v29  ;;  %290 = vmatpush.msra.mxu1 %v863_v37  ;;  %v902_v60 = vld [vmem:[%s791_s19 + $0xc8] sm:$0xff]  ;;  %v438_v63 = vsel %vm416_vm2, %v363_v50, 0.0  ;;  %v909_v0 = vld [vmem:[%s791_s19 + $0x158] sm:$0xff]  ;;  %v912_v5 = vld [vmem:[%s791_s19 + $0x1f0] sm:$0xff]  ;;  %v367_v19 = vmul.f32 %v828_v13, %v828_v13  ;;  %v442_v20 = vsel %vm416_vm2, %v365_v61, 0.0  ;;  %v444_v26 = vsel %vm416_vm2, %v366_v9, 0.0 }
  0x21   : > { %v425_v30 = vadd.f32 %v424_v27, %v423_v24  ;;  %309 = vmatpush.msra.mxu2 %v877_v46  ;;  %328 = vmatpush.msra.mxu3 %v898_v58  ;;  %v916_v7 = vld [vmem:[%s791_s19 + $0xc0] sm:$0xff]  ;;  %v927_v14 = vld [vmem:[%s791_s19 + $0x150] sm:$0xff]  ;;  %v930_v15 = vld [vmem:[%s791_s19 + $0x1e8] sm:$0xff] }
  0x22   : > { %272 = vmatpush.msra.mxu0 %v199_v35  ;;  %291 = vmatpush.msra.mxu1 %v872_v43  ;;  %v924_v11 = vld [vmem:[%s791_s19 + $0x80] sm:$0xff]  ;;  %v935_v18 = vld [vmem:[%s791_s19 + $0xb8] sm:$0xff]  ;;  %v943_v21 = vld [vmem:[%s791_s19 + $0x88] sm:$0xff] }
  0x23   : > { %v427_v36 = vadd.f32 %v426_v33, %v425_v30  ;;  %310 = vmatpush.msra.mxu2 %v886_v52  ;;  %329 = vmatpush.msra.mxu3 %v912_v5  ;;  %v210_v13 = vld [vmem:[%s791_s19 + $0xb0] sm:$0xff]  ;;  %v368_v24 = vmul.f32 %v924_v11, %v924_v11  ;;  %v964_v29 = vld [vmem:[%s791_s19 + $0x1d8] sm:$0xff]  ;;  %v209_v30 = vld [vmem:[%s791_s19 + $0xa8] sm:$0xff]  ;;  %v369_v32 = vmul.f32 %v943_v21, %v943_v21  ;;  %v446_v33 = vsel %vm416_vm2, %v367_v19, 0.0 }
  0x24   : > { %273 = vmatpush.msra.mxu0 %v198_v40  ;;  %292 = vmatpush.msra.mxu1 %v881_v48  ;;  %v206_v27 = vld [vmem:[%s791_s19 + $0x90] sm:$0xff]  ;;  %v975_v35 = vld [vmem:[%s791_s19 + $0x138] sm:$0xff]  ;;  %v989_v44 = vld [vmem:[%s791_s19 + $0x1c8] sm:$0xff]  ;;  %v373_v61 = vmul.f32 %v209_v30, %v209_v30  ;;  %v374_v9 = vmul.f32 %v210_v13, %v210_v13 }
  0x25   : > { %v429_v42 = vadd.f32 %v428_v39, %v427_v36  ;;  %311 = vmatpush.msra.mxu2 %v895_v57  ;;  %330 = vmatpush.msra.mxu3 %v930_v15  ;;  %v978_v36 = vld [vmem:[%s791_s19 + $0x1d0] sm:$0xff]  ;;  %v370_v39 = vmul.f32 %v206_v27, %v206_v27  ;;  %v448_v40 = vsel %vm416_vm2, %v368_v24, 0.0  ;;  %v996_v49 = vld [vmem:[%s791_s19 + $0x128] sm:$0xff]  ;;  %v999_v50 = vld [vmem:[%s791_s19 + $0x1c0] sm:$0xff] }
  0x26   : > { %274 = vmatpush.msra.mxu0 %v197_v34  ;;  %293 = vmatpush.msra.mxu1 %v890_v54  ;;  %v207_v34 = vld [vmem:[%s791_s19 + $0x98] sm:$0xff]  ;;  %v1006_v55 = vld [vmem:[%s791_s19 + $0x120] sm:$0xff] }
  0x27   : > { %v431_v47 = vadd.f32 %v430_v45, %v429_v42  ;;  %312 = vmatpush.msra.mxu2 %v909_v0  ;;  %v986_v42 = vld [vmem:[%s791_s19 + $0x130] sm:$0xff] }
  0x28   : > { %275 = vmatpush.msra.mxu0 %v196_v28  ;;  %294 = vmatpush.msra.mxu1 %v902_v60  ;;  %v961_v28 = vld [vmem:[%s791_s19 + $0x140] sm:$0xff] }
  0x29   : > { %v433_v53 = vadd.f32 %v432_v51, %v431_v47  ;;  %313 = vmatpush.msra.mxu2 %v927_v14  ;;  %v450_v47 = vsel %vm416_vm2, %v369_v32, 0.0 }
  0x2a   : > { %276 = vmatpush.msra.mxu0 %v195_v22  ;;  %295 = vmatpush.msra.mxu1 %v916_v7  ;;  %v946_v22 = vld [vmem:[%s791_s19 + $0x148] sm:$0xff] }
  0x2b   : > { %v435_v59 = vadd.f32 %v434_v56, %v433_v53  ;;  %314 = vmatpush.msra.mxu2 %v946_v22  ;;  %v1009_v56 = vld [vmem:[%s791_s19 + $0x1b8] sm:$0xff] }
  0x2c   : > { %277 = vmatpush.msra.mxu0 %v835_v17  ;;  %v949_v17 = vld [vmem:[%s791_s19 + $0x1e0] sm:$0xff]  ;;  %296 = vmatpush.msra.mxu1 %v935_v18 }
  0x2d   : > { %v437_v6 = vadd.f32 %v436_v62, %v435_v59  ;;  %331 = vmatpush.msra.mxu3 %v949_v17  ;;  %315 = vmatpush.msra.mxu2 %v961_v28  ;;  %v1016_v62 = vld [vmem:[%s791_s19 + $0x118] sm:$0xff] }
  0x2e   : > { %278 = vmatpush.msra.mxu0 %v825_v12  ;;  %297 = vmatpush.msra.mxu1 %v210_v13  ;;  %v1036_v13 = vld [vmem:[%s791_s19 + $0x1a0] sm:$0xff] }
  0x2f   : > { %v439_v16 = vadd.f32 %v438_v63, %v437_v6  ;;  %332 = vmatpush.msra.mxu3 %v964_v29  ;;  %316 = vmatpush.msra.mxu2 %v975_v35  ;;  %v1019_v63 = vld [vmem:[%s791_s19 + $0x1b0] sm:$0xff] }
  0x30   : > { %279 = vmatpush.msra.mxu0 %v818_v8  ;;  %298 = vmatpush.msra.mxu1 %v209_v30  ;;  %v208_v8 = vld [vmem:[%s791_s19 + $0xa0] sm:$0xff]  ;;  %v377_v30 = vmul.f32 %v902_v60, %v902_v60  ;;  %v379_v60 = vmul.f32 %v881_v48, %v881_v48 }
  0x31   : > { %v441_v23 = vadd.f32 %v440_v10, %v439_v16  ;;  %333 = vmatpush.msra.mxu3 %v978_v36  ;;  %317 = vmatpush.msra.mxu2 %v986_v42  ;;  %v372_v53 = vmul.f32 %v208_v8, %v208_v8  ;;  %v1027_v16 = vld [vmem:[%s791_s19 + $0x1a8] sm:$0xff] }
  0x32   : > { %280 = vmatpush.msra.mxu0 %v809_v4  ;;  %299 = vmatpush.msra.mxu1 %v208_v8  ;;  %v371_v4 = vmul.f32 %v207_v34, %v207_v34  ;;  %v1058_v8 = vld [vmem:[%s791_s19 + $0x188] sm:$0xff]  ;;  %v470_v48 = vsel %vm416_vm2, %v379_v60, 0.0  ;;  %v391_v60 = vmul.f32 %v975_v35, %v975_v35 }
  0x33   : > { %v443_v12 = vadd.f32 %v442_v20, %v441_v23  ;;  %334 = vmatpush.msra.mxu3 %v989_v44  ;;  %318 = vmatpush.msra.mxu2 %v996_v49  ;;  %v456_v10 = vsel %vm416_vm2, %v372_v53, 0.0  ;;  %v375_v20 = vmul.f32 %v935_v18, %v935_v18  ;;  %v221_v23 = vld [vmem:[%s791_s19 + $0x108] sm:$0xff]  ;;  %v1044_v18 = vld [vmem:[%s791_s19 + $0x198] sm:$0xff]  ;;  %v381_v53 = vmul.f32 %v863_v37, %v863_v37 }
  0x34   : > { %281 = vmatpush.msra.mxu0 %v806_v3  ;;  %300 = vmatpush.msra.mxu1 %v207_v34  ;;  %v452_v3 = vsel %vm416_vm2, %v370_v39, 0.0  ;;  %v378_v34 = vmul.f32 %v890_v54, %v890_v54  ;;  %v380_v54 = vmul.f32 %v872_v43, %v872_v43  ;;  %v383_v43 = vmul.f32 %v847_v25, %v847_v25 }
  0x35   : > { %v445_v38 = vadd.f32 %v444_v26, %v443_v12  ;;  %335 = vmatpush.msra.mxu3 %v999_v50  ;;  %319 = vmatpush.msra.mxu2 %v1006_v55  ;;  %v376_v26 = vmul.f32 %v916_v7, %v916_v7  ;;  %v462_v32 = vsel %vm416_vm2, %v375_v20, 0.0  ;;  %v1051_v7 = vld [vmem:[%s791_s19 + $0x190] sm:$0xff]  ;;  %v385_v37 = vmul.f32 %v221_v23, %v221_v23 }
  0x36   : > { %282 = vmatpush.msra.mxu0 %v803_v2  ;;  %301 = vmatpush.msra.mxu1 %v206_v27  ;;  %v454_v2 = vsel %vm416_vm2, %v371_v4, 0.0  ;;  %v460_v27 = vsel %vm416_vm2, %v374_v9, 0.0 }
  0x37   : > { %v447_v45 = vadd.f32 %v446_v33, %v445_v38  ;;  %336 = vmatpush.msra.mxu3 %v1009_v56  ;;  %320 = vmatpush.msra.mxu2 %v1016_v62  ;;  %v464_v38 = vsel %vm416_vm2, %v376_v26, 0.0  ;;  %v482_v25 = vsel %vm416_vm2, %v385_v37, 0.0 }
  0x38   : > { %283 = vmatpush.msra.mxu0 %v800_v1  ;;  %302 = vmatpush.msra.mxu1 %v943_v21  ;;  %v222_v1 = vld [vmem:[%s791_s19 + $0x110] sm:$0xff]  ;;  %v458_v21 = vsel %vm416_vm2, %v373_v61, 0.0  ;;  %v472_v61 = vsel %vm416_vm2, %v380_v54, 0.0 }
  0x39   : > { %v449_v51 = vadd.f32 %v448_v40, %v447_v45  ;;  %337 = vmatpush.msra.mxu3 %v1019_v63  ;;  %321 = vmatpush.msra.mxu2 %v222_v1  ;;  %v466_v40 = vsel %vm416_vm2, %v377_v30, 0.0  ;;  %v1065_v45 = vld [vmem:[%s791_s19 + $0x180] sm:$0xff]  ;;  %v386_v26 = vmul.f32 %v222_v1, %v222_v1 }
  0x3a   : > { %303 = vmatpush.msra.mxu1 %v924_v11  ;;  %v220_v11 = vld [vmem:[%s791_s19 + $0x100] sm:$0xff] }
  0x3b   : > { %v451_v59 = vadd.f32 %v450_v47, %v449_v51  ;;  %338 = vmatpush.msra.mxu3 %v1027_v16  ;;  %322 = vmatpush.msra.mxu2 %v221_v23  ;;  %v468_v47 = vsel %vm416_vm2, %v378_v34, 0.0  ;;  %v389_v23 = vmul.f32 %v996_v49, %v996_v49 }
  0x3d   : > { %v453_v6 = vadd.f32 %v452_v3, %v451_v59  ;;  %339 = vmatpush.msra.mxu3 %v1036_v13  ;;  %323 = vmatpush.msra.mxu2 %v220_v11  ;;  %v382_v59 = vmul.f32 %v856_v31, %v856_v31 }
  0x3f   : > { %v455_v19 = vadd.f32 %v454_v2, %v453_v6  ;;  %340 = vmatpush.msra.mxu3 %v1044_v18  ;;  %v474_v6 = vsel %vm416_vm2, %v381_v53, 0.0  ;;  %v394_v53 = vmul.f32 %v927_v14, %v927_v14 }
  0x41   : > { %v457_v24 = vadd.f32 %v456_v10, %v455_v19  ;;  %341 = vmatpush.msra.mxu3 %v1051_v7  ;;  %v384_v10 = vmul.f32 %v220_v11, %v220_v11  ;;  %v476_v19 = vsel %vm416_vm2, %v382_v59, 0.0  ;;  %v388_v11 = vmul.f32 %v1006_v55, %v1006_v55 }
  0x42   : > { %v490_v55 = vsel %vm416_vm2, %v389_v23, 0.0  ;;  %v406_v23 = vmul.f32 %v1019_v63, %v1019_v63 }
  0x43   : > { %v459_v12 = vadd.f32 %v458_v21, %v457_v24  ;;  %342 = vmatpush.msra.mxu3 %v1058_v8  ;;  %v478_v21 = vsel %vm416_vm2, %v383_v43, 0.0  ;;  %v480_v31 = vsel %vm416_vm2, %v384_v10, 0.0  ;;  %v397_v43 = vmul.f32 %v886_v52, %v886_v52 }
  0x44   : > { %v400_v52 = vmul.f32 %v1065_v45, %v1065_v45 }
  0x45   : > { %v461_v33 = vadd.f32 %v460_v27, %v459_v12  ;;  %343 = vmatpush.msra.mxu3 %v1065_v45  ;;  %v387_v12 = vmul.f32 %v1016_v62, %v1016_v62  ;;  %v488_v62 = vsel %vm416_vm2, %v388_v11, 0.0  ;;  %v253_v11 = vld [vmem:[%s796_s23] sm:$0xff] }
  0x46   : > { %257 = vst [vmem:[#allocation1] ss:$2 sm:$0xff] %v253_v11 }
  0x47   : > { %v463_v39 = vadd.f32 %v462_v32, %v461_v33  ;;  %v484_v32 = vsel %vm416_vm2, %v386_v26, 0.0  ;;  %v486_v1 = vsel %vm416_vm2, %v387_v12, 0.0  ;;  %v403_v12 = vmul.f32 %v1044_v18, %v1044_v18 }
  0x49   : > { %v465_v4 = vadd.f32 %v464_v38, %v463_v39  ;;  %v390_v38 = vmul.f32 %v986_v42, %v986_v42  ;;  %v494_v42 = vsel %vm416_vm2, %v391_v60, 0.0  ;;  %v518_v18 = vsel %vm416_vm2, %v403_v12, 0.0  ;;  %v252_v12 = vld [vmem:[#allocation2] sm:$0xf] }
  0x4b   : > { %v467_v51 = vadd.f32 %v466_v40, %v465_v4  ;;  %v392_v4 = vmul.f32 %v961_v28, %v961_v28  ;;  %v492_v49 = vsel %vm416_vm2, %v390_v38, 0.0 }
  0x4d   : > { %v469_v3 = vadd.f32 %v468_v47, %v467_v51  ;;  %v393_v47 = vmul.f32 %v946_v22, %v946_v22  ;;  %v496_v35 = vsel %vm416_vm2, %v392_v4, 0.0  ;;  %v500_v22 = vsel %vm416_vm2, %v394_v53, 0.0  ;;  %v260_v63 = vld.sshfl [vmem:[#allocation1] sm:$0xff pattern:$0x75316420] }
  0x4e   : > { %v261_v4 = vld.sshfl [vmem:[#allocation1 + $0x8] sm:$0xff pattern:$0x75316420]  ;;  %284 = vmatmul.f32.vlgmr.msra.gmra.mxu0 %v260_v63 }
  0x4f   : > { %v471_v2 = vadd.f32 %v470_v48, %v469_v3  ;;  %v395_v3 = vmul.f32 %v909_v0, %v909_v0  ;;  %v498_v28 = vsel %vm416_vm2, %v393_v47, 0.0  ;;  %304 = vmatmul.f32.vlgmr.msra.gmra.mxu1 %v261_v4 }
  0x51   : > { %v473_v9 = vadd.f32 %v472_v61, %v471_v2  ;;  %v396_v61 = vmul.f32 %v895_v57, %v895_v57  ;;  %v502_v14 = vsel %vm416_vm2, %v395_v3, 0.0  ;;  %v506_v57 = vsel %vm416_vm2, %v397_v43, 0.0 }
  0x52   : > { %v412_v3 = vmul.f32 %v949_v17, %v949_v17  ;;  %v415_v43 = vmul.f32 %v898_v58, %v898_v58 }
  0x53   : > { %v475_v20 = vadd.f32 %v474_v6, %v473_v9  ;;  %v398_v9 = vmul.f32 %v877_v46, %v877_v46  ;;  %v504_v0 = vsel %vm416_vm2, %v396_v61, 0.0  ;;  %v401_v46 = vmul.f32 %v1058_v8, %v1058_v8 }
  0x54   : > { %v404_v8 = vmul.f32 %v1036_v13, %v1036_v13  ;;  %v407_v13 = vmul.f32 %v1009_v56, %v1009_v56  ;;  %v409_v56 = vmul.f32 %v989_v44, %v989_v44 }
  0x55   : > { %v477_v24 = vadd.f32 %v476_v19, %v475_v20  ;;  %v399_v19 = vmul.f32 %v868_v41, %v868_v41  ;;  %v508_v37 = vsel %vm416_vm2, %v398_v9, 0.0  ;;  %v512_v41 = vsel %vm416_vm2, %v400_v52, 0.0 }
  0x56   : > { %v514_v45 = vsel %vm416_vm2, %v401_v46, 0.0 }
  0x57   : > { %v479_v27 = vadd.f32 %v478_v21, %v477_v24  ;;  %v510_v24 = vsel %vm416_vm2, %v399_v19, 0.0 }
  0x59   : > { %v481_v30 = vadd.f32 %v480_v31, %v479_v27  ;;  %v402_v31 = vmul.f32 %v1051_v7, %v1051_v7  ;;  %v405_v7 = vmul.f32 %v1027_v16, %v1027_v16  ;;  %v408_v16 = vmul.f32 %v999_v50, %v999_v50 }
  0x5a   : > { %v411_v50 = vmul.f32 %v964_v29, %v964_v29  ;;  %v536_v29 = vsel %vm416_vm2, %v412_v3, 0.0 }
  0x5b   : > { %v483_v33 = vadd.f32 %v482_v25, %v481_v30  ;;  %v254_v30 = vld [vmem:[%s796_s23 + $0x8] sm:$0xff] }
  0x5c   : > { %259 = vst [vmem:[#allocation1 + $0x10] ss:$2 sm:$0xff] %v254_v30 }
  0x5d   : > { %v485_v34 = vadd.f32 %v484_v32, %v483_v33  ;;  %v516_v32 = vsel %vm416_vm2, %v402_v31, 0.0 }
  0x5f   : > { %v487_v39 = vadd.f32 %v486_v1, %v485_v34  ;;  %v520_v34 = vsel %vm416_vm2, %v404_v8, 0.0 }
  0x61   : > { %v489_v40 = vadd.f32 %v488_v62, %v487_v39  ;;  %v522_v62 = vsel %vm416_vm2, %v405_v7, 0.0  ;;  %v524_v39 = vsel %vm416_vm2, %v406_v23, 0.0 }
  0x63   : > { %v491_v54 = vadd.f32 %v490_v55, %v489_v40  ;;  %v262_v55 = vld.sshfl [vmem:[#allocation1 + $0x10] sm:$0xff pattern:$0x75316420]  ;;  %v263_v40 = vld.sshfl [vmem:[#allocation1 + $0x18] sm:$0xff pattern:$0x75316420] }
  0x64   : > { %324 = vmatmul.f32.vlgmr.msra.gmra.mxu2 %v262_v55  ;;  %344 = vmatmul.f32.vlgmr.msra.gmra.mxu3 %v263_v40 }
  0x65   : > { %v493_v51 = vadd.f32 %v492_v49, %v491_v54  ;;  %v526_v54 = vsel %vm416_vm2, %v407_v13, 0.0 }
  0x67   : > { %v495_v48 = vadd.f32 %v494_v42, %v493_v51  ;;  %v410_v42 = vmul.f32 %v978_v36, %v978_v36  ;;  %v528_v51 = vsel %vm416_vm2, %v408_v16, 0.0  ;;  %v534_v36 = vsel %vm416_vm2, %v411_v50, 0.0 }
  0x69   : > { %v497_v59 = vadd.f32 %v496_v35, %v495_v48  ;;  %v530_v35 = vsel %vm416_vm2, %v409_v56, 0.0  ;;  %v532_v44 = vsel %vm416_vm2, %v410_v42, 0.0 }
  0x6b   : > { %v499_v2 = vadd.f32 %v498_v28, %v497_v59  ;;  %v413_v59 = vmul.f32 %v930_v15, %v930_v15  ;;  %v542_v15 = vsel %vm416_vm2, %v415_v43, 0.0 }
  0x6d   : > { %v501_v6 = vadd.f32 %v500_v22, %v499_v2  ;;  %v414_v22 = vmul.f32 %v912_v5, %v912_v5  ;;  %v538_v17 = vsel %vm416_vm2, %v413_v59, 0.0 }
  0x6f   : > { %v503_v10 = vadd.f32 %v502_v14, %v501_v6  ;;  %v540_v6 = vsel %vm416_vm2, %v414_v22, 0.0 }
  0x71   : > { %v505_v20 = vadd.f32 %v504_v0, %v503_v10 }
  0x73   : > { %v507_v21 = vadd.f32 %v506_v57, %v505_v20 }
  0x75   : > { %v509_v26 = vadd.f32 %v508_v37, %v507_v21 }
  0x77   : > { %v511_v27 = vadd.f32 %v510_v24, %v509_v26 }
  0x79   : > { %v513_v25 = vadd.f32 %v512_v41, %v511_v27 }
  0x7b   : > { %v515_v33 = vadd.f32 %v514_v45, %v513_v25  ;;  %v351_v25 = vld [vmem:[#allocation4] sm:$0x1] }
  0x7d   : > { %v517_v1 = vadd.f32 %v516_v32, %v515_v33 }
  0x7f   : > { %v519_v38 = vadd.f32 %v518_v18, %v517_v1 }
  0x81   : > { %v521_v60 = vadd.f32 %v520_v34, %v519_v38 }
  0x83   : > { %v523_v49 = vadd.f32 %v522_v62, %v521_v60 }
  0x85   : > { %v525_v47 = vadd.f32 %v524_v39, %v523_v49 }
  0x87   : > { %v527_v53 = vadd.f32 %v526_v54, %v525_v47 }
  0x89   : > { %v529_v48 = vadd.f32 %v528_v51, %v527_v53 }
  0x8b   : > { %v531_v28 = vadd.f32 %v530_v35, %v529_v48 }
  0x8d   : > { %v533_v61 = vadd.f32 %v532_v44, %v531_v28 }
  0x8f   : > { %v535_v2 = vadd.f32 %v534_v36, %v533_v61 }
  0x91   : > { %v537_v14 = vadd.f32 %v536_v29, %v535_v2 }
  0x93   : > { %v539_v9 = vadd.f32 %v538_v17, %v537_v14 }
  0x95   : > { %v541_v0 = vadd.f32 %v540_v6, %v539_v9 }
  0x97   : > { %v543_v10 = vadd.f32 %v542_v15, %v541_v0 }
  0x99   : > { %544 = vadd.xlane.f32.xlu0 %v543_v10 }
  0xcb   : > { %v285_v58 = vpop.f32.mrf.mxu0 }
  0xcc   : > { %v305_v46 = vpop.f32.mrf.mxu1 }
  0xcd   : > { %v306_v24 = vadd.f32 %v305_v46, %v285_v58 }
  0xe7   : > { %v325_v26 = vpop.f32.mrf.mxu2  ;;  %v345_v41 = vpop.f32.mrf.mxu3 }
  0xe8   : > { %v326_v31 = vadd.f32 %v325_v26, %v306_v24 }
  0xea   : > { %v346_v27 = vadd.f32 %v345_v41, %v326_v31 }
  0xec   : > { %v348_v45 = vadd.f32 %v346_v27, %v252_v12 }
  0xee   : > { %350 = vst.msk [vmem:[#allocation2] sm:$0xf] %vm349_vm3, %v348_v45 }
  0xef   : > { %659 = dma.vmem_to_hbm [thread:$0]  (%p666_p6), %s564_s25, 64, %s566_s28, [#allocation3]  }
 0x10c   : > { %v545_v19 = vpop.xlane.xlu0 %544 }
 0x10d   : > { %v546_v57 = vrot.slane %v545_v19, 4 }
 0x10f   : > { %v547_v5 = vadd.f32 %v546_v57, %v545_v19 }
 0x111   : > { %v548_v20 = vrot.slane %v547_v5, 2 }
 0x113   : > { %v549_v52 = vadd.f32 %v548_v20, %v547_v5 }
 0x115   : > { %v550_v37 = vrot.slane %v549_v52, 1 }
 0x117   : > { %v551_v21 = vadd.f32 %v550_v37, %v549_v52 }
 0x119   : > { %656 = vpush %v551_v21 }
 0x14a   : > { %s657_s7 = spop %656 }
 0x14b   : > { %v553_v30 = vstv %s657_s7 }
 0x14c   : > { %v554_v11 = vadd.f32 %v553_v30, %v351_v25 }
 0x14e   : > { %556 = vst.msk [vmem:[#allocation4] sm:$0x1] %vm555_vm4, %v554_v11 }
 0x14f   : > { %661 = dma.vmem_to_hbm [thread:$0]  (%p666_p6), %s576_s30, 16, %s578_s6, [#allocation5]  }
 0x150   : > { %742 = dma.done.wait (%p666_p6), [#allocation3], 64  }
 0x151   : > { %744 = vsyncadd (%p666_p6), [#allocation3], 4294967232 }
 0x152   : > { %746 = dma.done.wait (%p666_p6), [#allocation5], 16  }
 0x153   : > { %748 = vsyncadd (%p666_p6), [#allocation5], 4294967280 }
 0x154 PF: > { %s16_s12 = sadd.s32 1, %s751_s12  }
 0x155   : > { %p13_p7 = scmp.ge.s32.totalorder %s16_s12, 4  }
 0x157   :  { %15 = sbr.rel (!%p13_p7) target bundleno = 2 (0x2), region = 71 }
 0x15c   :  { %596 = vsyncpa [#allocation3], 1 }
 0x15d   :  { %598 = vsyncpa [#allocation3 + $0x1], 1 }
 0x15e   :  { %599 = vsyncpa [#allocation5], 1 }

</bundles_post_ra>
